<compile_context>
chip_gen: v7x
topology: tpu7x:2x2x1
jax: 0.10.0
libtpu: 0.0.40
codegen_flags: <defaults>
</compile_context>

<pallas_src>
import functools

import jax
import jax.numpy as jnp
from jax import lax
from jax.experimental import pallas as pl
from jax.experimental.pallas import tpu as pltpu

_LANE = 128
_ROWG = 64          # rows held in vregs while running one chunk loop
_SMOOTH = 1.0


def _binary_dice_kernel(p_ref, t_ref, num_ref, den_ref, *, hw):
    """Accumulate lane-wide per-row sums of p*t and p+t for one (rows, cols) tile."""
    s = pl.program_id(1)              # parallel HW split
    k = pl.program_id(2)              # inner (arbitrary) HW reduction step
    k_inner = pl.num_programs(2)

    @pl.when(k == 0)
    def _():
        num_ref[...] = jnp.zeros_like(num_ref)
        den_ref[...] = jnp.zeros_like(den_ref)

    tnc, thw = p_ref.shape
    n_chunks = thw // _LANE
    col0 = (s * k_inner + k) * thw    # global column of this tile's first lane

    g = min(_ROWG, tnc)               # row-group size; tnc is a multiple of g
    lane = lax.broadcasted_iota(jnp.int32, (g, _LANE), 1) + col0

    for r0 in range(0, tnc, g):       # tiny static loop (<= 4 groups)

        def chunk(j, carry):
            num_p, den_p = carry
            off = pl.multiple_of(j * _LANE, _LANE)
            # Mask the ragged HW tail in-kernel (replaces the old jnp.pad).
            valid = (lane + off) < hw
            pj = jnp.where(
                valid,
                p_ref[pl.ds(r0, g), pl.ds(off, _LANE)].astype(jnp.float32),
                0.0)
            tj = jnp.where(
                valid,
                t_ref[pl.ds(r0, g), pl.ds(off, _LANE)].astype(jnp.float32),
                0.0)
            return num_p + pj * tj, den_p + (pj + tj)

        zero = jnp.zeros((g, _LANE), jnp.float32)
        num_p, den_p = lax.fori_loop(0, n_chunks, chunk, (zero, zero),
                                     unroll=min(4, n_chunks))
        num_ref[pl.ds(r0, g), :] += num_p
        den_ref[pl.ds(r0, g), :] += den_p


def _round_up(x, m):
    return -(-x // m) * m


def _row_align(dtype):
    # Sublane packing requirement: f32 -> 8, bf16 -> 16, int8/bool -> 32.
    return {4: 8, 2: 16, 1: 32}.get(jnp.dtype(dtype).itemsize, 8)


def _is_v7x():
    try:
        return "v7" in jax.devices()[0].device_kind.lower()
    except Exception:
        return False


def _choose_tiles(nc, hw, bytes_per_elem, step_bytes, row_align):
    """Pick (tnc, thw) giving ~step_bytes of input HBM traffic per grid step."""
    hw128 = _round_up(hw, _LANE)
    # Column tile: near-equal 128-multiple strips so the masked tail is <128
    # lanes (e.g. hw=50176 -> thw=7168 x 7 exactly, instead of 2048 + padding).
    thw_cap = max(_LANE, (step_bytes // (_ROWG * bytes_per_elem)) // _LANE * _LANE)
    n_col_blocks = pl.cdiv(hw128, thw_cap)
    thw = _round_up(pl.cdiv(hw128, n_col_blocks), _LANE)
    # Row tile: one aligned block when N*C is small (avoids DMAing garbage
    # rows); otherwise a multiple of the 64-row register group, grown toward
    # the per-step byte target when hw is small.
    nc_al = _round_up(nc, row_align)
    if nc_al <= _ROWG:
        tnc = nc_al
    else:
        tnc = max(_ROWG, min(4 * _ROWG,
                             (step_bytes // (thw * bytes_per_elem)) // _ROWG * _ROWG))
        tnc = min(tnc, _round_up(nc_al, _ROWG))
    return tnc, thw


def binary_dice_loss(predict, target):
    """Pallas equivalent of BinaryDice(reduction='mean', activation=None)."""
    assert predict.shape == target.shape and predict.ndim == 4
    n, c, h, w = predict.shape
    nc, hw = n * c, h * w

    # Integer / bool masks would need a 32-row sublane tile and can't be
    # multiplied as-is; stream them in predict's dtype instead.
    if not jnp.issubdtype(target.dtype, jnp.floating):
        target = target.astype(predict.dtype)

    p2 = predict.reshape(nc, hw)      # free, row-major view
    t2 = target.reshape(nc, hw)

    isz_p = jnp.dtype(p2.dtype).itemsize
    isz_t = jnp.dtype(t2.dtype).itemsize
    row_align = max(_row_align(p2.dtype), _row_align(t2.dtype))

    v7x = _is_v7x()
    # ~2 MiB per input per grid step amortizes the ~0.35us step overhead to a
    # few %; ~4 MiB per input on v7x where the per-step DMA window at 3.2 TB/s
    # is much shorter.  Worst-case VMEM: 3 bufs x 8 MiB inputs + ~0.5 MiB out.
    step_bytes = (8 << 20) if v7x else (4 << 20)
    tnc, thw = _choose_tiles(nc, hw, isz_p + isz_t, step_bytes, row_align)

    grid_nc = pl.cdiv(nc, tnc)
    k_blocks = pl.cdiv(hw, thw)
    # Give the second v7x TensorCore work even when all rows fit one row tile.
    if grid_nc == 1 and k_blocks >= 2 and k_blocks % 2 == 0:
        hw_splits, k_inner = 2, k_blocks // 2
    else:
        hw_splits, k_inner = 1, k_blocks
    grid = (grid_nc, hw_splits, k_inner)

    in_kwargs = {"pipeline_mode": pl.Buffered(3)} if v7x else {}

    def _in_spec():
        return pl.BlockSpec((tnc, thw),
                            lambda i, s, k: (i, s * k_inner + k),
                            **in_kwargs)

    def _out_spec():
        return pl.BlockSpec((tnc, _LANE), lambda i, s, k: (i * hw_splits + s, 0))

    out_rows = grid_nc * hw_splits * tnc
    out_sds = jax.ShapeDtypeStruct((out_rows, _LANE), jnp.float32)

    num_out, den_out = pl.pallas_call(
        functools.partial(_binary_dice_kernel, hw=hw),
        out_shape=(out_sds, out_sds),
        grid_spec=pltpu.PrefetchScalarGridSpec(
            num_scalar_prefetch=0,
            grid=grid,
            in_specs=[_in_spec(), _in_spec()],
            out_specs=(_out_spec(), _out_spec()),
        ),
        compiler_params=pltpu.CompilerParams(
            dimension_semantics=("parallel", "parallel", "arbitrary"),
            vmem_limit_bytes=30 << 20,   # covers v7x worst case; > v5e 16 MiB default
        ),
        cost_estimate=pl.CostEstimate(
            flops=4 * nc * hw,
            transcendentals=0,
            bytes_accessed=nc * hw * (isz_p + isz_t) + 2 * out_rows * _LANE * 4,
        ),
    )(p2, t2)

    # Tiny finish in the wrapper: cross-lane + cross-split reduce, dice, mean.
    num = num_out.reshape(grid_nc, hw_splits, tnc, _LANE).sum(axis=(1, 3))
    den = den_out.reshape(grid_nc, hw_splits, tnc, _LANE).sum(axis=(1, 3))
    num = num.reshape(-1)[:nc]        # drops garbage rows from partial blocks
    den = den.reshape(-1)[:nc]
    dice_score = (2.0 * num + jnp.float32(_SMOOTH)) / (den + jnp.float32(_SMOOTH))
    return jnp.mean(1.0 - dice_score)


def _reference(predict, target):
    # Pure-JAX reference mirroring the PyTorch forward.
    p = predict.astype(jnp.float32)
    t = target.astype(jnp.float32)
    num = jnp.sum(p * t, axis=(2, 3))
    den = jnp.sum(p, axis=(2, 3)) + jnp.sum(t, axis=(2, 3))
    dice_score = (2.0 * num + _SMOOTH) / (den + _SMOOTH)
    return jnp.mean(1.0 - dice_score)


if __name__ == "__main__":
    key = jax.random.PRNGKey(0)
    k1, k2 = jax.random.split(key)

    # Small shapes: batch=2, channels=4, spatial=16x16 (NCHW), fully aligned.
    N, C, H, W = 2, 4, 16, 16
    predict = jax.random.uniform(k1, (N, C, H, W), dtype=jnp.float32)
    target = jax.random.bernoulli(k2, p=0.5, shape=(N, C, H, W)).astype(jnp.float32)

    loss = jax.block_until_ready(binary_dice_loss(predict, target))
    ref = _reference(predict, target)
    assert jnp.allclose(loss, ref, rtol=1e-5, atol=1e-5), (loss, ref)

    # Ragged shape exercises the no-pad path: in-kernel HW lane mask +
    # garbage-row drop in the wrapper (nc=6, hw=510, neither tile-aligned).
    N2, C2, H2, W2 = 2, 3, 17, 30
    p_r = jax.random.uniform(k1, (N2, C2, H2, W2), dtype=jnp.float32)
    t_r = jax.random.bernoulli(k2, p=0.5, shape=(N2, C2, H2, W2)).astype(jnp.float32)
    loss_r = jax.block_until_ready(binary_dice_loss(p_r, t_r))
    ref_r = _reference(p_r, t_r)
    assert jnp.allclose(loss_r, ref_r, rtol=1e-5, atol=1e-5), (loss_r, ref_r)

    print("KERNEL_OK")
</pallas_src>

<mosaic_0001>
module attributes {stable_mosaic.version = 11 : i64} {
  func.func @_binary_dice_kernel(%arg0: i32, %arg1: i32, %arg2: i32, %arg3: memref<8x256xf32, #tpu.memory_space<vmem>>, %arg4: memref<8x256xf32, #tpu.memory_space<vmem>>, %arg5: memref<8x128xf32, #tpu.memory_space<vmem>>, %arg6: memref<8x128xf32, #tpu.memory_space<vmem>>) attributes {dimension_semantics = [#tpu.dimension_semantics<parallel>, #tpu.dimension_semantics<parallel>, #tpu.dimension_semantics<arbitrary>], iteration_bounds = array<i64: 1, 1, 1>, scalar_prefetch = 0 : i64, scratch_operands = 0 : i64, tpu.core_type = #tpu.core_type<tc>, window_params = [{transform_indices = @transform_0, window_bounds = array<i64: 8, 256>}, {transform_indices = @transform_1, window_bounds = array<i64: 8, 256>}, {transform_indices = @transform_2, window_bounds = array<i64: 8, 128>}, {transform_indices = @transform_3, window_bounds = array<i64: 8, 128>}]} {
    %c0_i32 = arith.constant 0 : i32
    %0 = arith.cmpi eq, %arg2, %c0_i32 : i32
    %1 = arith.extui %0 : i1 to i32
    %c0_i32_0 = arith.constant 0 : i32
    %2 = arith.cmpi ne, %1, %c0_i32_0 : i32
    scf.if %2 {
      %cst_21 = arith.constant 0.000000e+00 : f32
      %52 = vector.broadcast %cst_21 : f32 to vector<8x128xf32>
      %c0_22 = arith.constant 0 : index
      %c0_23 = arith.constant 0 : index
      %53 = vector.load %arg5[%c0_22, %c0_23] : memref<8x128xf32, #tpu.memory_space<vmem>>, vector<8x128xf32>
      tpu.vector_store %arg5[%c0_22, %c0_23], %52 {strides = array<i32>} : memref<8x128xf32, #tpu.memory_space<vmem>>, vector<8x128xf32>,
      %cst_24 = arith.constant 0.000000e+00 : f32
      %54 = vector.broadcast %cst_24 : f32 to vector<8x128xf32>
      %c0_25 = arith.constant 0 : index
      %c0_26 = arith.constant 0 : index
      %55 = vector.load %arg6[%c0_25, %c0_26] : memref<8x128xf32, #tpu.memory_space<vmem>>, vector<8x128xf32>
      tpu.vector_store %arg6[%c0_25, %c0_26], %54 {strides = array<i32>} : memref<8x128xf32, #tpu.memory_space<vmem>>, vector<8x128xf32>,
    } else {
    }
    %c1_i32 = arith.constant 1 : i32
    %3 = arith.muli %arg1, %c1_i32 : i32
    %4 = arith.addi %3, %arg2 : i32
    %c256_i32 = arith.constant 256 : i32
    %5 = arith.muli %4, %c256_i32 : i32
    %6 = tpu.iota {dimensions = array<i32: 1>} : vector<8x128xi32>
    %7 = vector.broadcast %5 : i32 to vector<8x128xi32>
    %8 = arith.addi %6, %7 : vector<8x128xi32>
    %cst = arith.constant 0.000000e+00 : f32
    %9 = vector.broadcast %cst : f32 to vector<8x128xf32>
    %c0_i32_1 = arith.constant 0 : i32
    %c128_i32 = arith.constant 128 : i32
    %10 = arith.muli %c0_i32_1, %c128_i32 : i32
    %11 = tpu.assume_multiple %10, 128 : i32
    %12 = vector.broadcast %11 : i32 to vector<8x128xi32>
    %13 = arith.addi %8, %12 : vector<8x128xi32>
    %c256_i32_2 = arith.constant 256 : i32
    %14 = vector.broadcast %c256_i32_2 : i32 to vector<8x128xi32>
    %15 = arith.cmpi slt, %13, %14 : vector<8x128xi32>
    %c0 = arith.constant 0 : index
    %16 = arith.index_cast %11 : i32 to index
    %17 = vector.load %arg3[%c0, %16] : memref<8x256xf32, #tpu.memory_space<vmem>>, vector<8x128xf32>
    %cst_3 = arith.constant 0.000000e+00 : f32
    %18 = vector.broadcast %cst_3 : f32 to vector<8x128xf32>
    %19 = arith.select %15, %17, %18 : vector<8x128xi1>, vector<8x128xf32>
    %c0_4 = arith.constant 0 : index
    %20 = arith.index_cast %11 : i32 to index
    %21 = vector.load %arg4[%c0_4, %20] : memref<8x256xf32, #tpu.memory_space<vmem>>, vector<8x128xf32>
    %cst_5 = arith.constant 0.000000e+00 : f32
    %22 = vector.broadcast %cst_5 : f32 to vector<8x128xf32>
    %23 = arith.select %15, %21, %22 : vector<8x128xi1>, vector<8x128xf32>
    %24 = arith.mulf %19, %23 : vector<8x128xf32>
    %25 = arith.addf %9, %24 : vector<8x128xf32>
    %26 = arith.addf %19, %23 : vector<8x128xf32>
    %27 = arith.addf %9, %26 : vector<8x128xf32>
    %c1_i32_6 = arith.constant 1 : i32
    %c128_i32_7 = arith.constant 128 : i32
    %28 = arith.muli %c1_i32_6, %c128_i32_7 : i32
    %29 = tpu.assume_multiple %28, 128 : i32
    %30 = vector.broadcast %29 : i32 to vector<8x128xi32>
    %31 = arith.addi %8, %30 : vector<8x128xi32>
    %c256_i32_8 = arith.constant 256 : i32
    %32 = vector.broadcast %c256_i32_8 : i32 to vector<8x128xi32>
    %33 = arith.cmpi slt, %31, %32 : vector<8x128xi32>
    %c0_9 = arith.constant 0 : index
    %34 = arith.index_cast %29 : i32 to index
    %35 = vector.load %arg3[%c0_9, %34] : memref<8x256xf32, #tpu.memory_space<vmem>>, vector<8x128xf32>
    %cst_10 = arith.constant 0.000000e+00 : f32
    %36 = vector.broadcast %cst_10 : f32 to vector<8x128xf32>
    %37 = arith.select %33, %35, %36 : vector<8x128xi1>, vector<8x128xf32>
    %c0_11 = arith.constant 0 : index
    %38 = arith.index_cast %29 : i32 to index
    %39 = vector.load %arg4[%c0_11, %38] : memref<8x256xf32, #tpu.memory_space<vmem>>, vector<8x128xf32>
    %cst_12 = arith.constant 0.000000e+00 : f32
    %40 = vector.broadcast %cst_12 : f32 to vector<8x128xf32>
    %41 = arith.select %33, %39, %40 : vector<8x128xi1>, vector<8x128xf32>
    %42 = arith.mulf %37, %41 : vector<8x128xf32>
    %43 = arith.addf %25, %42 : vector<8x128xf32>
    %44 = arith.addf %37, %41 : vector<8x128xf32>
    %45 = arith.addf %27, %44 : vector<8x128xf32>
    %c2_i32 = arith.constant 2 : i32
    %c0_13 = arith.constant 0 : index
    %c0_14 = arith.constant 0 : index
    %46 = vector.load %arg5[%c0_13, %c0_14] : memref<8x128xf32, #tpu.memory_space<vmem>>, vector<8x128xf32>
    %47 = arith.addf %46, %43 : vector<8x128xf32>
    %c0_15 = arith.constant 0 : index
    %c0_16 = arith.constant 0 : index
    %48 = vector.load %arg5[%c0_15, %c0_16] : memref<8x128xf32, #tpu.memory_space<vmem>>, vector<8x128xf32>
    tpu.vector_store %arg5[%c0_15, %c0_16], %47 {strides = array<i32>} : memref<8x128xf32, #tpu.memory_space<vmem>>, vector<8x128xf32>,
    %c0_17 = arith.constant 0 : index
    %c0_18 = arith.constant 0 : index
    %49 = vector.load %arg6[%c0_17, %c0_18] : memref<8x128xf32, #tpu.memory_space<vmem>>, vector<8x128xf32>
    %50 = arith.addf %49, %45 : vector<8x128xf32>
    %c0_19 = arith.constant 0 : index
    %c0_20 = arith.constant 0 : index
    %51 = vector.load %arg6[%c0_19, %c0_20] : memref<8x128xf32, #tpu.memory_space<vmem>>, vector<8x128xf32>
    tpu.vector_store %arg6[%c0_19, %c0_20], %50 {strides = array<i32>} : memref<8x128xf32, #tpu.memory_space<vmem>>, vector<8x128xf32>,
    return
  }
  func.func @transform_0(%arg0: i32, %arg1: i32, %arg2: i32) -> (i32, i32) {
    %c1_i32 = arith.constant 1 : i32
    %0 = arith.muli %arg1, %c1_i32 : i32
    %1 = arith.addi %0, %arg2 : i32
    %c0_i32 = arith.constant 0 : i32
    return %arg0, %1 : i32, i32
  }
  func.func @transform_1(%arg0: i32, %arg1: i32, %arg2: i32) -> (i32, i32) {
    %c1_i32 = arith.constant 1 : i32
    %0 = arith.muli %arg1, %c1_i32 : i32
    %1 = arith.addi %0, %arg2 : i32
    %c0_i32 = arith.constant 0 : i32
    return %arg0, %1 : i32, i32
  }
  func.func @transform_2(%arg0: i32, %arg1: i32, %arg2: i32) -> (i32, i32) {
    %c1_i32 = arith.constant 1 : i32
    %0 = arith.muli %arg0, %c1_i32 : i32
    %1 = arith.addi %0, %arg1 : i32
    %c0_i32 = arith.constant 0 : i32
    %c0_i32_0 = arith.constant 0 : i32
    return %1, %c0_i32 : i32, i32
  }
  func.func @transform_3(%arg0: i32, %arg1: i32, %arg2: i32) -> (i32, i32) {
    %c1_i32 = arith.constant 1 : i32
    %0 = arith.muli %arg0, %c1_i32 : i32
    %1 = arith.addi %0, %arg1 : i32
    %c0_i32 = arith.constant 0 : i32
    %c0_i32_0 = arith.constant 0 : i32
    return %1, %c0_i32 : i32, i32
  }
}

</mosaic_0001>

<bundles_post_ra>
// kernel: tpu_custom_call.1
= control target key start
LH: loop header
LB: loop body
LE: loop exit
PB: predicated region body
PF: predicated region fallthrough
CT: control target
= control target key end

     0   :  { %9 = vsyncpa [#allocation3], 0  ;;  %s304_s0 = inlined_call_operand.hbm [shape: f32[8,256], index: 0, kind: input, shape index: {}]   ;;  %s305_s1 = inlined_call_operand.hbm [shape: f32[8,256], index: 1, kind: input, shape index: {}]   ;;  %s306_s2 = inlined_call_operand.hbm [shape: f32[8,128], index: 2, kind: output, shape index: {0}]   ;;  %s307_s3 = inlined_call_operand.hbm [shape: f32[8,128], index: 3, kind: output, shape index: {1}]  }
   0x1   :  { %10 = vsyncpa [#allocation6], 0 }
   0x2   :  { %11 = vsyncpa [#allocation4], 0 }
   0x3   :  { %12 = vsyncpa [#allocation9], 0  ;;  %s232_s12 = smov [#allocation2]   ;;  %s233_s14 = smov [#allocation5]  }
   0x4   :  { %s23_s13 = sshll.u32 %s232_s12, 4  ;;  %s37_s15 = sshll.u32 %s233_s14, 4  ;;  %s24_s13 = int_to_ptr.vmem [resolvable:$true] %s23_s13  ;;  %s38_s15 = int_to_ptr.vmem [resolvable:$true] %s37_s15 }
   0x5   :  { %s136_s18 = scalar_lea.hbm %s304_s0, 256 }
   0x6   :  { %p137_p0 = scmp.ne.s32.totalorder %s304_s0, %s136_s18  ;;  %p140_p1 = scmp.lt.u32.totalorder %s136_s18, %s304_s0 }
   0x8   :  { %p142_p2 = pnand %p140_p1, %p137_p0 }
   0xa   :  { %145 = shalt.err (!%p142_p2)
}
   0xb   :  { %s146_s23 = scalar_lea.vmem %s24_s13, 256  ;;  %p151_p4 = scmp.lt.s32.totalorder %s24_s13, %s24_s13 }
   0xc   :  { %p147_p3 = scmp.ne.s32.totalorder %s24_s13, %s146_s23  ;;  %p152_p5 = scmp.lt.s32.totalorder %s146_s23, %s146_s23 }
   0xe   :  { %p153_p6 = por %p152_p5, %p151_p4 }
  0x10   :  { %p154_p7 = pnand %p153_p6, %p147_p3 }
  0x12   :  { %157 = shalt.err (!%p154_p7)
}
  0x13   :  { %26 = dma.hbm_to_vmem [thread:$0]  %s304_s0, 256, %s24_s13, [#allocation3]  }
  0x14   :  { %s158_s28 = scalar_lea.hbm %s305_s1, 256 }
  0x15   :  { %p159_p8 = scmp.ne.s32.totalorder %s305_s1, %s158_s28  ;;  %p162_p9 = scmp.lt.u32.totalorder %s158_s28, %s305_s1 }
  0x17   :  { %p164_p10 = pnand %p162_p9, %p159_p8 }
  0x19   :  { %167 = shalt.err (!%p164_p10)
}
  0x1a   :  { %s168_s6 = scalar_lea.vmem %s38_s15, 256  ;;  %p173_p12 = scmp.lt.s32.totalorder %s38_s15, %s38_s15 }
  0x1b   :  { %p169_p11 = scmp.ne.s32.totalorder %s38_s15, %s168_s6  ;;  %p174_p13 = scmp.lt.s32.totalorder %s168_s6, %s168_s6 }
  0x1d   :  { %p175_p0 = por %p174_p13, %p173_p12 }
  0x1f   :  { %p176_p1 = pnand %p175_p0, %p169_p11 }
  0x21   :  { %179 = shalt.err (!%p176_p1)
}
  0x22   :  { %40 = dma.hbm_to_vmem [thread:$0]  %s305_s1, 256, %s38_s15, [#allocation6]  }
  0x23   :  { %224 = dma.done.wait [#allocation3], 256  }
  0x24   :  { %225 = vsyncadd [#allocation3], 4294967040 }
  0x25   :  { %226 = dma.done.wait [#allocation6], 256  }
  0x26   :  { %227 = vsyncadd [#allocation6], 4294967040  ;;  %v68_v0 = vld [vmem:[#allocation2] sm:$0xff]  ;;  %v70_v1 = vld [vmem:[#allocation5] sm:$0xff]  ;;  %s234_s8 = smov [#allocation7]   ;;  %s235_s10 = smov [#allocation8]  }
  0x27   :  { %v80_v2 = vld [vmem:[#allocation2 + $0x8] sm:$0xff]  ;;  %v72_v3 = vmul.f32 %v70_v1, %v68_v0  ;;  %v83_v4 = vld [vmem:[#allocation5 + $0x8] sm:$0xff]  ;;  %v74_v5 = vadd.f32 %v70_v1, %v68_v0  ;;  %s104_s9 = sshll.u32 %s234_s8, 4  ;;  %s117_s11 = sshll.u32 %s235_s10, 4  ;;  %s105_s9 = int_to_ptr.vmem [resolvable:$true] %s104_s9  ;;  %s118_s11 = int_to_ptr.vmem [resolvable:$true] %s117_s11 }
  0x28   :  { %v85_v6 = vmul.f32 %v83_v4, %v80_v2  ;;  %v87_v7 = vadd.f32 %v83_v4, %v80_v2  ;;  %s180_s1 = scalar_lea.vmem %s105_s9, 128  ;;  %p185_p3 = scmp.lt.s32.totalorder %s105_s9, %s105_s9 }
  0x29   :  { %p181_p2 = scmp.ne.s32.totalorder %s105_s9, %s180_s1  ;;  %p186_p4 = scmp.lt.s32.totalorder %s180_s1, %s180_s1 }
  0x2a   :  { %v86_v8 = vadd.f32 %v85_v6, %v72_v3  ;;  %v88_v9 = vadd.f32 %v87_v7, %v74_v5 }
  0x2b   :  { %p187_p5 = por %p186_p4, %p185_p3 }
  0x2c   :  { %91 = vst [vmem:[#allocation7] sm:$0xff] %v86_v8  ;;  %94 = vst [vmem:[#allocation8] sm:$0xff] %v88_v9 }
  0x2d   :  { %p188_p6 = pnand %p187_p5, %p181_p2 }
  0x2f   :  { %191 = shalt.err (!%p188_p6)
}
  0x30   :  { %s192_s14 = scalar_lea.hbm %s306_s2, 128 }
  0x31   :  { %p193_p7 = scmp.ne.s32.totalorder %s306_s2, %s192_s14  ;;  %p196_p8 = scmp.lt.u32.totalorder %s192_s14, %s306_s2 }
  0x33   :  { %p198_p9 = pnand %p196_p8, %p193_p7 }
  0x35   :  { %201 = shalt.err (!%p198_p9)
}
  0x36   :  { %107 = dma.vmem_to_hbm [thread:$0]  %s105_s9, 128, %s306_s2, [#allocation4]  }
  0x37   :  { %s202_s21 = scalar_lea.vmem %s118_s11, 128  ;;  %p207_p11 = scmp.lt.s32.totalorder %s118_s11, %s118_s11 }
  0x38   :  { %p203_p10 = scmp.ne.s32.totalorder %s118_s11, %s202_s21  ;;  %p208_p12 = scmp.lt.s32.totalorder %s202_s21, %s202_s21 }
  0x3a   :  { %p209_p13 = por %p208_p12, %p207_p11 }
  0x3c   :  { %p210_p0 = pnand %p209_p13, %p203_p10 }
  0x3e   :  { %213 = shalt.err (!%p210_p0)
}
  0x3f   :  { %s214_s24 = scalar_lea.hbm %s307_s3, 128 }
  0x40   :  { %p215_p1 = scmp.ne.s32.totalorder %s307_s3, %s214_s24  ;;  %p218_p2 = scmp.lt.u32.totalorder %s214_s24, %s307_s3 }
  0x42   :  { %p220_p3 = pnand %p218_p2, %p215_p1 }
  0x44   :  { %223 = shalt.err (!%p220_p3)
}
  0x45   :  { %120 = dma.vmem_to_hbm [thread:$0]  %s118_s11, 128, %s307_s3, [#allocation9]  }
  0x46   :  { %228 = dma.done.wait [#allocation4], 128  }
  0x47   :  { %229 = vsyncadd [#allocation4], 4294967168 }
  0x48   :  { %230 = dma.done.wait [#allocation9], 128  }
  0x49   :  { %231 = vsyncadd [#allocation9], 4294967168 }
  0x4a   :  { %127 = vsyncpa [#allocation3], 1 }
  0x4b   :  { %128 = vsyncpa [#allocation6], 1 }
  0x4c   :  { %129 = vsyncpa [#allocation4], 1 }
  0x4d   :  { %130 = vsyncpa [#allocation9], 1 }

</bundles_post_ra>
